<compile_context>
chip_gen: v6e
topology: v6e:2x2x1
jax: 0.10.0
libtpu: 0.0.40
codegen_flags: <defaults>
</compile_context>

<pallas_src>
import jax
import jax.numpy as jnp
from jax import lax
from jax.experimental import pallas as pl
from jax.experimental.pallas import tpu as pltpu


def _self_attention_kernel(x_ref, m_ref, c_ref, w3_ref, b3_ref,
                           w4g_ref, b4g_ref, o_ref):
    x = x_ref[0]                                                                    # [C, N]

    # Fused QK projection: p = M @ x + c   (M = W1^T W2, c = W1^T b2).
    p = jnp.dot(m_ref[...], x, preferred_element_type=jnp.float32) + c_ref[...]    # [C, N]
    # Value projection (conv3, 1x1 == channel matmul).
    h = jnp.dot(w3_ref[...], x, preferred_element_type=jnp.float32) + b3_ref[...]  # [C, N]

    # Scores n[i, j] = sum_c x[c, i] * p[c, j]
    # (== torch matmul(ft^T, gt) up to a per-column shift that softmax cancels).
    n = lax.dot_general(x, p, dimension_numbers=(((0,), (0,)), ((), ())),
                        preferred_element_type=jnp.float32)                        # [N, N]

    # torch F.softmax(n, dim=1) == softmax over axis 0 here (over i, per column j).
    # Normalization deferred until after the PV matmul.
    e = jnp.exp(n - jnp.max(n, axis=0, keepdims=True))                             # [N, N]
    r = pl.reciprocal(jnp.sum(e, axis=0, keepdims=True), approx=True)              # [1, N]

    # o[c, j] = sum_i h[c, i] * beta[i, j]  ->  (h @ e), then per-column scale.
    o = jnp.dot(h, e, preferred_element_type=jnp.float32) * r                      # [C, N]

    # conv4 (gamma pre-folded) + residual.
    o4 = jnp.dot(w4g_ref[...], o, preferred_element_type=jnp.float32) + b4g_ref[...]
    o_ref[0] = (o4 + x).astype(o_ref.dtype)
    # NOTE: for large spatial sizes (e.g. H=W=64 -> N=4096) the full [N, N]
    # score matrix would exceed v7x's 64 MiB VMEM; a key-blocked online-softmax
    # (flash pattern) over an extra grid axis would be needed in that regime.


def self_attention_pallas(x_nchw, params):
    """x_nchw: [B, C, H, W] float32. params: torch-convention weights (Cout, Cin)."""
    w1, b1, w2, b2, w3, b3, w4, b4, gamma = params
    B, C, H, W = x_nchw.shape
    N = H * W
    f32 = jnp.float32

    # NCHW -> [B, C, N] is a pure reshape (row-major), no transpose needed.
    x_cn = x_nchw.reshape(B, C, N).astype(f32)

    # Fold conv1/conv2 into the bilinear form, and gamma into conv4.
    m_qk = (w1.T @ w2).astype(f32)                   # [C, C]
    c_qk = (w1.T @ b2).astype(f32)[:, None]          # [C, 1]
    g = jnp.asarray(gamma, f32).reshape(())
    w4g = (g * w4).astype(f32)                       # [C, C]
    b4g = (g * b4).astype(f32)[:, None]              # [C, 1]
    w3f = w3.astype(f32)                             # [C, C]
    b3f = b3.astype(f32)[:, None]                    # [C, 1]

    def full_spec(*shape):
        nd = len(shape)
        return pl.BlockSpec(shape, lambda b, _nd=nd: (0,) * _nd)

    out = pl.pallas_call(
        _self_attention_kernel,
        out_shape=jax.ShapeDtypeStruct((B, C, N), f32),
        grid=(B,),
        in_specs=[
            pl.BlockSpec((1, C, N), lambda b: (b, 0, 0)),   # x, one batch per grid step
            full_spec(C, C), full_spec(C, 1),               # fused QK:  M, c
            full_spec(C, C), full_spec(C, 1),               # conv3:     W3, b3
            full_spec(C, C), full_spec(C, 1),               # conv4*g:   W4g, b4g
        ],
        out_specs=pl.BlockSpec((1, C, N), lambda b: (b, 0, 0)),
        compiler_params=pltpu.CompilerParams(dimension_semantics=("parallel",)),
    )(x_cn, m_qk, c_qk, w3f, b3f, w4g, b4g)

    # [B, C, N] -> NCHW is again a pure reshape.
    return out.reshape(B, C, H, W)


def self_attention_ref(x, params):
    """Pure-JAX reference mirroring the PyTorch forward exactly (NCHW)."""
    w1, b1, w2, b2, w3, b3, w4, b4, gamma = params
    B, C, H, W = x.shape
    C8 = C // 8

    def conv1x1(inp, w, b):
        return jnp.einsum('bchw,oc->bohw', inp, w) + b[None, :, None, None]

    f = conv1x1(x, w1, b1)
    g = conv1x1(x, w2, b2)
    h = conv1x1(x, w3, b3)
    ht = h.reshape(B, C, -1)
    ft = f.reshape(B, C8, -1)
    gt = g.reshape(B, C8, -1)
    n = jnp.einsum('bci,bcj->bij', ft, gt)
    beta = jax.nn.softmax(n, axis=1)
    o = jnp.einsum('bcn,bnm->bcm', ht, beta).reshape(x.shape)
    o = conv1x1(o, w4, b4)
    return gamma * o + x


if __name__ == "__main__":
    key = jax.random.PRNGKey(0)
    B, C, H, W = 2, 16, 16, 16
    C8 = C // 8
    ks = jax.random.split(key, 10)

    x = jax.random.normal(ks[0], (B, C, H, W), jnp.float32)

    w1 = jax.random.normal(ks[1], (C8, C), jnp.float32) * 0.1
    b1 = jax.random.normal(ks[2], (C8,), jnp.float32) * 0.1
    w2 = jax.random.normal(ks[3], (C8, C), jnp.float32) * 0.1
    b2 = jax.random.normal(ks[4], (C8,), jnp.float32) * 0.1
    w3 = jax.random.normal(ks[5], (C, C), jnp.float32) * 0.1
    b3 = jax.random.normal(ks[6], (C,), jnp.float32) * 0.1
    w4 = jax.random.normal(ks[7], (C, C), jnp.float32) * 0.1
    b4 = jax.random.normal(ks[8], (C,), jnp.float32) * 0.1
    # Module __init__ sets gamma1 = 0 (which would make out == x); use a nonzero
    # deterministic value so the attention path is actually exercised.
    gamma = jnp.float32(0.5)

    params = (w1, b1, w2, b2, w3, b3, w4, b4, gamma)

    y = self_attention_pallas(x, params)
    jax.block_until_ready(y)

    y_ref = self_attention_ref(x, params)
    assert y.shape == x.shape
    # Tolerance slightly loosened: bilinear/gamma folds + deferred normalization +
    # EUP approx reciprocal reassociate the FP math vs the straight reference.
    assert jnp.allclose(y, y_ref, atol=2e-3, rtol=2e-3), "mismatch vs reference"

    print("KERNEL_OK")
</pallas_src>

<mosaic_0001>
module attributes {stable_mosaic.version = 11 : i64} {
  func.func @_self_attention_kernel(%arg0: i32, %arg1: memref<1x16x256xf32, #tpu.memory_space<vmem>>, %arg2: memref<16x16xf32, #tpu.memory_space<vmem>>, %arg3: memref<16x1xf32, #tpu.memory_space<vmem>>, %arg4: memref<16x16xf32, #tpu.memory_space<vmem>>, %arg5: memref<16x1xf32, #tpu.memory_space<vmem>>, %arg6: memref<16x16xf32, #tpu.memory_space<vmem>>, %arg7: memref<16x1xf32, #tpu.memory_space<vmem>>, %arg8: memref<1x16x256xf32, #tpu.memory_space<vmem>>) attributes {dimension_semantics = [#tpu.dimension_semantics<parallel>], iteration_bounds = array<i64: 2>, scalar_prefetch = 0 : i64, scratch_operands = 0 : i64, tpu.core_type = #tpu.core_type<tc>, window_params = [{transform_indices = @transform_0, window_bounds = array<i64: 1, 16, 256>}, {pipeline_mode = #tpu.pipeline_mode<synchronous>, transform_indices = @transform_1, window_bounds = array<i64: 16, 16>}, {pipeline_mode = #tpu.pipeline_mode<synchronous>, transform_indices = @transform_2, window_bounds = array<i64: 16, 1>}, {pipeline_mode = #tpu.pipeline_mode<synchronous>, transform_indices = @transform_3, window_bounds = array<i64: 16, 16>}, {pipeline_mode = #tpu.pipeline_mode<synchronous>, transform_indices = @transform_4, window_bounds = array<i64: 16, 1>}, {pipeline_mode = #tpu.pipeline_mode<synchronous>, transform_indices = @transform_5, window_bounds = array<i64: 16, 16>}, {pipeline_mode = #tpu.pipeline_mode<synchronous>, transform_indices = @transform_6, window_bounds = array<i64: 16, 1>}, {transform_indices = @transform_7, window_bounds = array<i64: 1, 16, 256>}]} {
    %c0 = arith.constant 0 : index
    %c0_0 = arith.constant 0 : index
    %c0_1 = arith.constant 0 : index
    %0 = vector.load %arg1[%c0, %c0_0, %c0_1] : memref<1x16x256xf32, #tpu.memory_space<vmem>>, vector<1x16x256xf32>
    %1 = vector.shape_cast %0 : vector<1x16x256xf32> to vector<16x256xf32>
    %c0_2 = arith.constant 0 : index
    %c0_3 = arith.constant 0 : index
    %2 = vector.load %arg2[%c0_2, %c0_3] : memref<16x16xf32, #tpu.memory_space<vmem>>, vector<16x16xf32>
    %cst = arith.constant dense<0.000000e+00> : vector<16x256xf32>
    %3 = tpu.matmul %2, %1, %cst {dimension_numbers = #tpu.dot_dimension_numbers<[1], [0], [0], [1], [0, 0, 1, 1], [], []>} : vector<16x16xf32>, vector<16x256xf32>, vector<16x256xf32> -> vector<16x256xf32>
    %c0_4 = arith.constant 0 : index
    %c0_5 = arith.constant 0 : index
    %4 = vector.load %arg3[%c0_4, %c0_5] : memref<16x1xf32, #tpu.memory_space<vmem>>, vector<16x1xf32>
    %5 = vector.broadcast %4 : vector<16x1xf32> to vector<16x256xf32>
    %6 = arith.addf %3, %5 : vector<16x256xf32>
    %c0_6 = arith.constant 0 : index
    %c0_7 = arith.constant 0 : index
    %7 = vector.load %arg4[%c0_6, %c0_7] : memref<16x16xf32, #tpu.memory_space<vmem>>, vector<16x16xf32>
    %cst_8 = arith.constant dense<0.000000e+00> : vector<16x256xf32>
    %8 = tpu.matmul %7, %1, %cst_8 {dimension_numbers = #tpu.dot_dimension_numbers<[1], [0], [0], [1], [0, 0, 1, 1], [], []>} : vector<16x16xf32>, vector<16x256xf32>, vector<16x256xf32> -> vector<16x256xf32>
    %c0_9 = arith.constant 0 : index
    %c0_10 = arith.constant 0 : index
    %9 = vector.load %arg5[%c0_9, %c0_10] : memref<16x1xf32, #tpu.memory_space<vmem>>, vector<16x1xf32>
    %10 = vector.broadcast %9 : vector<16x1xf32> to vector<16x256xf32>
    %11 = arith.addf %8, %10 : vector<16x256xf32>
    %cst_11 = arith.constant dense<0.000000e+00> : vector<256x256xf32>
    %12 = tpu.matmul %1, %6, %cst_11 {dimension_numbers = #tpu.dot_dimension_numbers<[0], [0], [1], [1], [0, 1, 1, 1], [], []>} : vector<16x256xf32>, vector<16x256xf32>, vector<256x256xf32> -> vector<256x256xf32>
    %cst_12 = arith.constant dense<0xFF800000> : vector<256xf32>
    %13 = vector.multi_reduction <maximumf>, %12, %cst_12 [0] : vector<256x256xf32> to vector<256xf32>
    %14 = vector.shape_cast %13 : vector<256xf32> to vector<1x256xf32>
    %15 = vector.broadcast %14 : vector<1x256xf32> to vector<256x256xf32>
    %16 = arith.subf %12, %15 : vector<256x256xf32>
    %17 = math.exp %16 : vector<256x256xf32>
    %cst_13 = arith.constant dense<0.000000e+00> : vector<256xf32>
    %18 = vector.multi_reduction <add>, %17, %cst_13 [0] : vector<256x256xf32> to vector<256xf32>
    %19 = vector.shape_cast %18 : vector<256xf32> to vector<1x256xf32>
    %20 = tpu.reciprocal %19 {approx = true} : vector<1x256xf32> -> vector<1x256xf32>
    %cst_14 = arith.constant dense<0.000000e+00> : vector<16x256xf32>
    %21 = tpu.matmul %11, %17, %cst_14 {dimension_numbers = #tpu.dot_dimension_numbers<[1], [0], [0], [1], [0, 0, 1, 1], [], []>} : vector<16x256xf32>, vector<256x256xf32>, vector<16x256xf32> -> vector<16x256xf32>
    %22 = vector.broadcast %20 : vector<1x256xf32> to vector<16x256xf32>
    %23 = arith.mulf %21, %22 : vector<16x256xf32>
    %c0_15 = arith.constant 0 : index
    %c0_16 = arith.constant 0 : index
    %24 = vector.load %arg6[%c0_15, %c0_16] : memref<16x16xf32, #tpu.memory_space<vmem>>, vector<16x16xf32>
    %cst_17 = arith.constant dense<0.000000e+00> : vector<16x256xf32>
    %25 = tpu.matmul %24, %23, %cst_17 {dimension_numbers = #tpu.dot_dimension_numbers<[1], [0], [0], [1], [0, 0, 1, 1], [], []>} : vector<16x16xf32>, vector<16x256xf32>, vector<16x256xf32> -> vector<16x256xf32>
    %c0_18 = arith.constant 0 : index
    %c0_19 = arith.constant 0 : index
    %26 = vector.load %arg7[%c0_18, %c0_19] : memref<16x1xf32, #tpu.memory_space<vmem>>, vector<16x1xf32>
    %27 = vector.broadcast %26 : vector<16x1xf32> to vector<16x256xf32>
    %28 = arith.addf %25, %27 : vector<16x256xf32>
    %29 = arith.addf %28, %1 : vector<16x256xf32>
    %c0_20 = arith.constant 0 : index
    %c0_21 = arith.constant 0 : index
    %c0_22 = arith.constant 0 : index
    %30 = vector.load %arg8[%c0_20, %c0_21, %c0_22] : memref<1x16x256xf32, #tpu.memory_space<vmem>>, vector<1x16x256xf32>
    %31 = vector.shape_cast %30 : vector<1x16x256xf32> to vector<16x256xf32>
    %32 = vector.shape_cast %29 : vector<16x256xf32> to vector<1x16x256xf32>
    tpu.vector_store %arg8[%c0_20, %c0_21, %c0_22], %32 {strides = array<i32>} : memref<1x16x256xf32, #tpu.memory_space<vmem>>, vector<1x16x256xf32>,
    return
  }
  func.func @transform_0(%arg0: i32) -> (i32, i32, i32) {
    %c0_i32 = arith.constant 0 : i32
    %c0_i32_0 = arith.constant 0 : i32
    %c0_i32_1 = arith.constant 0 : i32
    return %arg0, %c0_i32, %c0_i32_0 : i32, i32, i32
  }
  func.func @transform_1(%arg0: i32) -> (i32, i32) {
    %c0_i32 = arith.constant 0 : i32
    %c0_i32_0 = arith.constant 0 : i32
    %c0_i32_1 = arith.constant 0 : i32
    return %c0_i32, %c0_i32_0 : i32, i32
  }
  func.func @transform_2(%arg0: i32) -> (i32, i32) {
    %c0_i32 = arith.constant 0 : i32
    %c0_i32_0 = arith.constant 0 : i32
    %c0_i32_1 = arith.constant 0 : i32
    return %c0_i32, %c0_i32_0 : i32, i32
  }
  func.func @transform_3(%arg0: i32) -> (i32, i32) {
    %c0_i32 = arith.constant 0 : i32
    %c0_i32_0 = arith.constant 0 : i32
    %c0_i32_1 = arith.constant 0 : i32
    return %c0_i32, %c0_i32_0 : i32, i32
  }
  func.func @transform_4(%arg0: i32) -> (i32, i32) {
    %c0_i32 = arith.constant 0 : i32
    %c0_i32_0 = arith.constant 0 : i32
    %c0_i32_1 = arith.constant 0 : i32
    return %c0_i32, %c0_i32_0 : i32, i32
  }
  func.func @transform_5(%arg0: i32) -> (i32, i32) {
    %c0_i32 = arith.constant 0 : i32
    %c0_i32_0 = arith.constant 0 : i32
    %c0_i32_1 = arith.constant 0 : i32
    return %c0_i32, %c0_i32_0 : i32, i32
  }
  func.func @transform_6(%arg0: i32) -> (i32, i32) {
    %c0_i32 = arith.constant 0 : i32
    %c0_i32_0 = arith.constant 0 : i32
    %c0_i32_1 = arith.constant 0 : i32
    return %c0_i32, %c0_i32_0 : i32, i32
  }
  func.func @transform_7(%arg0: i32) -> (i32, i32, i32) {
    %c0_i32 = arith.constant 0 : i32
    %c0_i32_0 = arith.constant 0 : i32
    %c0_i32_1 = arith.constant 0 : i32
    return %arg0, %c0_i32, %c0_i32_0 : i32, i32, i32
  }
}

</mosaic_0001>

<bundles_post_ra>
// kernel: tpu_custom_call.1
= control target key start
LH: loop header
LB: loop body
LE: loop exit
PB: predicated region body
PF: predicated region fallthrough
CT: control target
= control target key end

     0   :  { %12 = vsyncpa [#allocation3], 0  ;;  %s2713_s0 = inlined_call_operand.hbm [shape: f32[2,16,256], index: 0, kind: input, shape index: {}]   ;;  %s2714_s1 = inlined_call_operand.vmem [shape: f32[16,16], index: 1, kind: input, shape index: {}]   ;;  %s2715_s2 = inlined_call_operand.vmem [shape: f32[16,1], index: 2, kind: input, shape index: {}]   ;;  %s2716_s3 = inlined_call_operand.vmem [shape: f32[16,16], index: 3, kind: input, shape index: {}]   ;;  %s2717_s4 = inlined_call_operand.vmem [shape: f32[16,1], index: 4, kind: input, shape index: {}]   ;;  %s2718_s5 = inlined_call_operand.vmem [shape: f32[16,16], index: 5, kind: input, shape index: {}]   ;;  %s2719_s6 = inlined_call_operand.vmem [shape: f32[16,1], index: 6, kind: input, shape index: {}]   ;;  %s2720_s7 = inlined_call_operand.hbm [shape: f32[2,16,256], index: 7, kind: output, shape index: {}]  }
   0x1   :  { %14 = vsyncpa [#allocation3 + $0x1], 0 }
   0x2   :  { %15 = vsyncpa [#allocation4], 0 }
   0x3   :  { %17 = vsyncpa [#allocation4 + $0x1], 0  ;;  %s1914_s24 = smov 0   ;;  %s1916_s25 = smov 0  }
   0x4   :  { %s1918_s26 = smov 0   ;;  %s1920_s27 = smov 0  }
   0x5 LB: > { %s1935_s28 = sadd.s32 4294967295, %s1864_s27   ;;  %s1528_s29 = sadd.s32 4294967294, %s1864_s27   ;;  %s1864_s27 = sphi %s1920_s27, %s2806_s27   ;;  %s1860_s26 = sphi %s1918_s26, %s2805_s26   ;;  %s1856_s25 = sphi %s1916_s25, %s2804_s25   ;;  %s1852_s24 = sphi %s1914_s24, %s2803_s24  }
   0x6   : > { %s1939_s30 = sadd.s32 1, %s1864_s27   ;;  %s30_s8 = sadd.s32 1, %s1860_s26 }
   0x7   : > { %s27_s9 = ssub.s32 %s1864_s27, %s1939_s30  ;;  %p37_p0 = scmp.ne.s32.totalorder %s1860_s26, %s1856_s25 }
   0x8   : > { %p28_p1 = scmp.eq.s32.totalorder %s27_s9, 0  ;;  %p38_p2 = scmp.eq.s32.totalorder %s1864_s27, 0 }
   0x9   : > { %p43_p3 = scmp.ne.s32.totalorder %s1856_s25, %s1852_s24  ;;  %p44_p4 = scmp.eq.s32.totalorder %s1935_s28, 0 }
   0xa   : > { %s1951_s10 = scalar_select %p28_p1, %s1860_s26, %s30_s8  }
   0xb   : > { %p1953_p5 = por %p38_p2, %p37_p0  ;;  %p1957_p6 = por %p44_p4, %p43_p3 }
   0xc   : > { %p193_p7 = scmp.eq.s32.totalorder %s1935_s28, 1  ;;  %p199_p8 = scmp.eq.s32.totalorder %s1528_s29, 1 }
   0xd   : > { %s2748_s12 = scalar_select %p1957_p6, 1, 0 }
   0xe   : > { %p1594_p10 = scmp.lt.s32.totalorder %s1864_s27, 2  ;;  %p1964_p11 = por %p193_p7, %p37_p0 }
   0xf   : > { %p1968_p12 = por %p199_p8, %p43_p3  ;;  %s237_s15 = sand.u32 1, %s1860_s26  }
  0x10   : > { %s2749_s13 = scalar_select %p1964_p11, 1, 0 }
  0x11   : > { %s2750_s14 = scalar_select %p1968_p12, 1, 0 }
  0x12   : > { %s1580_s16 = sshll.u32 %s1864_s27, 9  ;;  %s1531_s17 = sshll.u32 %s237_s15, 5 }
  0x13   : > { %s1977_s20 = scalar_lea.hbm %s2713_s0, %s1580_s16  ;;  %s241_s21 = scalar_lea.vmem [#allocation2], %s1531_s17 }
  0x14   : > { %s248_s22 = sshll.u32 %s241_s21, 4  ;;  %p1981_p13 = pnand %p1594_p10, %p1953_p5  ;;  %s1985_s22 = int_to_ptr.vmem [resolvable:$true] %s248_s22 }
  0x15   : > { %s1987_s29 = scalar_lea.sflag [#allocation3], %s237_s15  ;;  %s1772_s8 = scalar_lea.hbm %s1977_s20, 512 }
  0x16   : > { %p1773_p0 = scmp.ne.s32.totalorder %s1977_s20, %s1772_s8  ;;  %p1774_p1 = pneg %p1981_p13 }
  0x17   : > { %s1777_s17 = scalar_lea.hbm %s2713_s0, 1024  ;;  %p1778_p4 = scmp.lt.s32.totalorder %s1977_s20, %s2713_s0 }
  0x18   : > { %p1775_p2 = pnand %p1774_p1, %p1773_p0  ;;  %p1779_p5 = scmp.lt.s32.totalorder %s1777_s17, %s1772_s8 }
  0x1a   : > { %p1776_p3 = pneg %p1775_p2  ;;  %p1780_p7 = por %p1779_p5, %p1778_p4 }
  0x1c   : > { %p1781_p8 = pnand %p1780_p7, %p1776_p3 }
  0x1e   : > { %1784 = shalt.err (!%p1781_p8)
}
  0x1f   : > { %s1785_s15 = scalar_lea.vmem %s1985_s22, 512  ;;  %s1866_s19 = smov [#allocation2]  }
  0x20   : > { %p1786_p10 = scmp.ne.s32.totalorder %s1985_s22, %s1785_s15  ;;  %s1790_s21 = sshll.u32 %s1866_s19, 4  ;;  %s1791_s21 = int_to_ptr.vmem [resolvable:$false] %s1790_s21 }
  0x21   : > { %s1792_s9 = scalar_lea.vmem %s1791_s21, 1024  ;;  %p1793_p2 = scmp.lt.s32.totalorder %s1985_s22, %s1791_s21 }
  0x22   : > { %p1788_p9 = pnand %p1786_p10, %p1774_p1  ;;  %p1794_p12 = scmp.lt.s32.totalorder %s1792_s9, %s1785_s15 }
  0x24   : > { %p1789_p0 = pneg %p1788_p9  ;;  %p1795_p11 = por %p1794_p12, %p1793_p2 }
  0x26   : > { %p1796_p6 = pnand %p1795_p11, %p1789_p0 }
  0x28   : > { %1799 = shalt.err (!%p1796_p6)
}
  0x29   : > { %s1867_s8 = smov 256   ;;  %s1868_s16 = smov 16  }
  0x2a   : > { %1589 = dma.hbm_to_vmem [thread:$0]  (!%p1981_p13), %s1977_s20, 512, %s1985_s22, %s1987_s29, %s1867_s8, %s1867_s8, %s1868_s16  }
  0x2b   : > { %p1534_p9 = scmp.ge.s32.totalorder %s1864_s27, 1  ;;  %p256_p1 = scmp.lt.s32.totalorder %s1864_s27, 3 }
  0x2d   : > { %p257_p3 = pnand %p1534_p9, %p256_p1 }
  0x2f   : > { %260 = sbr.rel (%p257_p3) target bundleno = 1149 (0x47d), region = 48 }
  0x34   : > { %s2011_s17 = sand.u32 1, %s1856_s25   ;;  %p2752_p6 = scmp.ne.s32.totalorder %s2748_s12, 0 }
  0x35   : > { %s1535_s11 = sshll.u32 %s2011_s17, 5  ;;  %s263_s18 = scalar_lea.sflag [#allocation3], %s2011_s17 }
  0x36   : > { %s2017_s15 = scalar_lea.vmem [#allocation2], %s1535_s11 }
  0x37   : > { %1843 = dma.done.wait (%p2752_p6), %s263_s18, 512  }
  0x38   : > { %1845 = vsyncadd (%p2752_p6), %s263_s18, 4294966784  ;;  %v1869_v0 = vmov 0   ;;  %v2723_v1 = vmov 0.0   ;;  %v304_v2 = vld [vmem:[%s2715_s2 + $0x8] sm:$0xff]  ;;  %v300_v3 = vld [vmem:[%s2017_s15 + $0x18] sm:$0xff]  ;;  %vm315_vm0 = vcmask 130048  }
  0x39   : > { %1634 = vset.pattern.permute.xlu0 %v1869_v0  ;;  %386 = vmatprep.mubr.f32.mxu1 %v2723_v1  ;;  %v299_v4 = vld [vmem:[%s2017_s15 + $0x10] sm:$0xff]  ;;  %v298_v5 = vld [vmem:[%s2017_s15 + $0x8] sm:$0xff]  ;;  %v297_v6 = vld [vmem:[%s2017_s15] sm:$0xff]  ;;  %s296_s12 = scalar_lea.vmem [#allocation5], %s1535_s11  ;;  %s1581_s29 = sshll.u32 %s1935_s28, 9 }
  0x3a   : > { %720 = vmatprep.mubr.f32.mxu0 %v2723_v1  ;;  %312 = vperm.xlu0 %1634, %v304_v2   ;;  %v303_v7 = vld [vmem:[%s2715_s2] sm:$0xff]  ;;  %v302_v9 = vld [vmem:[%s2714_s1 + $0x8] sm:$0xff]  ;;  %s1455_s23 = sshll.u32 %s296_s12, 4  ;;  %s2669_s21 = scalar_lea.hbm %s2720_s7, %s1581_s29  ;;  %s2663_s23 = int_to_ptr.vmem [resolvable:$true] %s1455_s23 }
  0x3b   : > { %350 = vmatprep.subr.mxu1 %v300_v3  ;;  %v301_v8 = vld [vmem:[%s2714_s1] sm:$0xff]  ;;  %496 = vxpose.xlu1.b32.start [1/2] (short) %v297_v6, 128  ;;  %v400_v11 = vld [vmem:[%s2716_s3 + $0x8] sm:$0xff]  ;;  %s1442_s28 = scalar_lea.sflag [#allocation4], %s2011_s17  ;;  %s1800_s9 = scalar_lea.vmem %s2663_s23, 512 }
  0x3c   : > { %351 = vmatpush1.msra.mxu1 %v299_v4  ;;  %v399_v10 = vld [vmem:[%s2716_s3] sm:$0xff]  ;;  %v402_v12 = vld [vmem:[%s2717_s4 + $0x8] sm:$0xff]  ;;  %p1801_p11 = scmp.ne.s32.totalorder %s2663_s23, %s1800_s9  ;;  %p2800_p12 = scmp.ne.s32.totalorder %s2749_s13, 0 }
  0x3d   : > { %352 = vmatprep.subr.mxu1 %v298_v5  ;;  %v401_v55 = vld [vmem:[%s2717_s4] sm:$0xff]  ;;  %v1339_v57 = vld [vmem:[%s2719_s6 + $0x8] sm:$0xff]  ;;  %s1871_s8 = smov [#allocation5]  }
  0x3e   : > { %353 = vmatpush1.msra.mxu1 %v297_v6  ;;  %307 = vperm.xlu0 %1634, %v303_v7   ;;  %v1338_v56 = vld [vmem:[%s2719_s6] sm:$0xff]  ;;  %p1802_p13 = pnand %p1801_p11, %p2800_p12  ;;  %s1804_s16 = sshll.u32 %s1871_s8, 4  ;;  %s1805_s16 = int_to_ptr.vmem [resolvable:$false] %s1804_s16 }
  0x3f   : > { %1537 = vmatmul.mubr.msk.f32.vlgmr.msra.gmra.mxu1 %vm315_vm0, %v301_v8  ;;  %447 = vmatprep.subr.mxu1 %v300_v3  ;;  %s1806_s18 = scalar_lea.vmem %s1805_s16, 1024  ;;  %p1807_p5 = scmp.lt.s32.totalorder %s2663_s23, %s1805_s16 }
  0x40   : > { %392 = vmatprep.mubr.f32.mxu1 %v2723_v1  ;;  %448 = vmatpush1.msra.mxu1 %v299_v4  ;;  %p1803_p4 = pneg %p1802_p13  ;;  %p1808_p7 = scmp.lt.s32.totalorder %s1806_s18, %s1800_s9 }
  0x41   : > { %497 = vxpose.xlu1.b32.end [2/2] (short) %v299_v4, 128  ;;  %449 = vmatprep.subr.mxu1 %v298_v5 }
  0x42   : > { %450 = vmatpush1.msra.mxu1 %v297_v6  ;;  %p1809_p8 = por %p1808_p7, %p1807_p5 }
  0x43   : > { %1538 = vmatmul.mubr.msk.f32.gmra.mxu1 %vm315_vm0, %v302_v9 }
  0x44   : > { %483 = vmatprep.mubr.f32.mxu1 %v2723_v1  ;;  %p1810_p10 = pnand %p1809_p8, %p1803_p4 }
  0x47   : > { %1539 = vmatmul.mubr.msk.f32.vlgmr.msra.gmra.mxu1 %vm315_vm0, %v399_v10 }
  0x48   : > { %489 = vmatprep.mubr.f32.mxu1 %v2723_v1 }
  0x4b   : > { %1540 = vmatmul.mubr.msk.f32.gmra.mxu1 %vm315_vm0, %v400_v11 }
  0x5c   : > { %528 = vxpose.xlu0.b32.start [1/2] (short) %v298_v5, 128 }
  0x5f   : > { %1635 = vset.pattern.permute.xlu1 %v1869_v0 }
  0x60   : > { %529 = vxpose.xlu0.b32.end [2/2] (short) %v300_v3, 128 }
  0x97   : > { %405 = vperm.xlu1 %1635, %v401_v55  }
  0x9b   : > { %1342 = vperm.xlu1 %1635, %v1338_v56  }
  0x9f   : > { %1347 = vperm.xlu1 %1635, %v1339_v57  }
  0xb5   : > { %v313_v18 = vpop.permute.xlu0 %312 }
  0xb9   : > { %v512_v13 = vpop.trf.xlu1  ;;  %v308_v24 = vpop.permute.xlu0 %307 }
  0xbd   : > { %v513_v14 = vpop.trf.xlu1 }
  0xc1   : > { %410 = vperm.xlu0 %1634, %v402_v12   ;;  %v514_v15 = vpop.trf.xlu1 }
  0xc5   : > { %v515_v16 = vpop.trf.xlu1 }
  0xc9   : > { %v516_v21 = vpop.trf.xlu1 }
  0xcd   : > { %v517_v28 = vpop.trf.xlu1 }
  0xd1   : > { %v518_v29 = vpop.trf.xlu1 }
  0xd5   : > { %v519_v30 = vpop.trf.xlu1 }
  0xd8   : > { %v544_v34 = vpop.trf.xlu0 }
  0xd9   : > { %v520_v31 = vpop.trf.xlu1 }
  0xdc   : > { %v545_v36 = vpop.trf.xlu0 }
  0xdd   : > { %v521_v32 = vpop.trf.xlu1 }
  0xe0   : > { %v546_v38 = vpop.trf.xlu0 }
  0xe1   : > { %v522_v33 = vpop.trf.xlu1 }
  0xe4   : > { %v547_v40 = vpop.trf.xlu0 }
  0xe5   : > { %v523_v35 = vpop.trf.xlu1 }
  0xe8   : > { %v548_v42 = vpop.trf.xlu0 }
  0xe9   : > { %v524_v37 = vpop.trf.xlu1 }
  0xec   : > { %v549_v44 = vpop.trf.xlu0 }
  0xed   : > { %v525_v39 = vpop.trf.xlu1 }
  0xf0   : > { %v550_v45 = vpop.trf.xlu0 }
  0xf1   : > { %v526_v41 = vpop.trf.xlu1 }
  0xf4   : > { %v551_v46 = vpop.trf.xlu0 }
  0xf5   : > { %v527_v43 = vpop.trf.xlu1 }
  0xf8   : > { %v552_v47 = vpop.trf.xlu0 }
  0xfc   : > { %v553_v48 = vpop.trf.xlu0 }
  0xff   : > { %v388_v17 = vpop.f32.mrf.mxu1 }
 0x100   : > { %v389_v27 = vadd.f32 %v388_v17, %v308_v24  ;;  %v554_v49 = vpop.trf.xlu0 }
 0x101   : > { %v390_v19 = vpop.f32.mrf.mxu1 }
 0x102   : > { %v391_v26 = vadd.f32 %v390_v19, %v308_v24 }
 0x103   : > { %v394_v20 = vpop.f32.mrf.mxu1 }
 0x104   : > { %v395_v25 = vadd.f32 %v394_v20, %v313_v18  ;;  %v555_v50 = vpop.trf.xlu0 }
 0x105   : > { %v396_v22 = vpop.f32.mrf.mxu1 }
 0x106   : > { %v397_v23 = vadd.f32 %v396_v22, %v313_v18 }
 0x108   : > { %684 = vmatprep.subr.mxu0 %v397_v23  ;;  %v556_v51 = vpop.trf.xlu0 }
 0x109   : > { %685 = vmatpush1.msra.mxu0 %v395_v25 }
 0x10a   : > { %686 = vmatprep.subr.mxu0 %v391_v26 }
 0x10b   : > { %687 = vmatpush1.msra.mxu0 %v389_v27 }
 0x10c   : > { %1541 = vmatmul.mubr.msk.f32.vlgmr.msra.gmra.mxu0 %vm315_vm0, %v512_v13  ;;  %v557_v52 = vpop.trf.xlu0 }
 0x10d   : > { %726 = vmatprep.mubr.f32.mxu0 %v2723_v1 }
 0x110   : > { %1542 = vmatmul.mubr.msk.f32.gmra.mxu0 %vm315_vm0, %v513_v14  ;;  %v558_v53 = vpop.trf.xlu0 }
 0x111   : > { %732 = vmatprep.mubr.f32.mxu0 %v2723_v1 }
 0x114   : > { %1543 = vmatmul.mubr.msk.f32.gmra.mxu0 %vm315_vm0, %v514_v15  ;;  %v559_v54 = vpop.trf.xlu0 }
 0x115   : > { %738 = vmatprep.mubr.f32.mxu0 %v2723_v1 }
 0x118   : > { %1544 = vmatmul.mubr.msk.f32.gmra.mxu0 %vm315_vm0, %v515_v16 }
 0x119   : > { %744 = vmatprep.mubr.f32.mxu0 %v2723_v1 }
 0x11c   : > { %1545 = vmatmul.mubr.msk.f32.gmra.mxu0 %vm315_vm0, %v516_v21 }
 0x11d   : > { %750 = vmatprep.mubr.f32.mxu0 %v2723_v1 }
 0x120   : > { %1546 = vmatmul.mubr.msk.f32.gmra.mxu0 %vm315_vm0, %v517_v28 }
 0x121   : > { %756 = vmatprep.mubr.f32.mxu0 %v2723_v1 }
 0x124   : > { %1547 = vmatmul.mubr.msk.f32.gmra.mxu0 %vm315_vm0, %v518_v29 }
 0x125   : > { %762 = vmatprep.mubr.f32.mxu0 %v2723_v1 }
 0x128   : > { %1548 = vmatmul.mubr.msk.f32.gmra.mxu0 %vm315_vm0, %v519_v30 }
 0x129   : > { %768 = vmatprep.mubr.f32.mxu0 %v2723_v1 }
 0x12c   : > { %1549 = vmatmul.mubr.msk.f32.gmra.mxu0 %vm315_vm0, %v520_v31 }
 0x12d   : > { %774 = vmatprep.mubr.f32.mxu0 %v2723_v1 }
 0x130   : > { %1550 = vmatmul.mubr.msk.f32.gmra.mxu0 %vm315_vm0, %v521_v32 }
 0x131   : > { %780 = vmatprep.mubr.f32.mxu0 %v2723_v1 }
 0x134   : > { %1551 = vmatmul.mubr.msk.f32.gmra.mxu0 %vm315_vm0, %v522_v33 }
 0x135   : > { %786 = vmatprep.mubr.f32.mxu0 %v2723_v1 }
 0x138   : > { %1552 = vmatmul.mubr.msk.f32.gmra.mxu0 %vm315_vm0, %v523_v35 }
 0x139   : > { %792 = vmatprep.mubr.f32.mxu0 %v2723_v1 }
 0x13c   : > { %1553 = vmatmul.mubr.msk.f32.gmra.mxu0 %vm315_vm0, %v524_v37 }
 0x13d   : > { %798 = vmatprep.mubr.f32.mxu0 %v2723_v1 }
 0x140   : > { %1554 = vmatmul.mubr.msk.f32.gmra.mxu0 %vm315_vm0, %v525_v39 }
 0x141   : > { %804 = vmatprep.mubr.f32.mxu0 %v2723_v1 }
 0x144   : > { %1555 = vmatmul.mubr.msk.f32.gmra.mxu0 %vm315_vm0, %v526_v41 }
 0x145   : > { %810 = vmatprep.mubr.f32.mxu0 %v2723_v1 }
 0x148   : > { %1556 = vmatmul.mubr.msk.f32.gmra.mxu0 %vm315_vm0, %v527_v43 }
 0x149   : > { %816 = vmatprep.mubr.f32.mxu0 %v2723_v1 }
 0x14c   : > { %1557 = vmatmul.mubr.msk.f32.gmra.mxu0 %vm315_vm0, %v544_v34 }
 0x14d   : > { %822 = vmatprep.mubr.f32.mxu0 %v2723_v1 }
 0x150   : > { %1558 = vmatmul.mubr.msk.f32.gmra.mxu0 %vm315_vm0, %v545_v36 }
 0x151   : > { %828 = vmatprep.mubr.f32.mxu0 %v2723_v1 }
 0x154   : > { %1559 = vmatmul.mubr.msk.f32.gmra.mxu0 %vm315_vm0, %v546_v38 }
 0x155   : > { %834 = vmatprep.mubr.f32.mxu0 %v2723_v1 }
 0x158   : > { %1560 = vmatmul.mubr.msk.f32.gmra.mxu0 %vm315_vm0, %v547_v40 }
 0x159   : > { %840 = vmatprep.mubr.f32.mxu0 %v2723_v1 }
 0x15c   : > { %1561 = vmatmul.mubr.msk.f32.gmra.mxu0 %vm315_vm0, %v548_v42 }
 0x15d   : > { %846 = vmatprep.mubr.f32.mxu0 %v2723_v1 }
 0x160   : > { %1562 = vmatmul.mubr.msk.f32.gmra.mxu0 %vm315_vm0, %v549_v44 }
 0x161   : > { %852 = vmatprep.mubr.f32.mxu0 %v2723_v1 }
 0x164   : > { %1563 = vmatmul.mubr.msk.f32.gmra.mxu0 %vm315_vm0, %v550_v45 }
 0x165   : > { %858 = vmatprep.mubr.f32.mxu0 %v2723_v1 }
 0x168   : > { %1564 = vmatmul.mubr.msk.f32.gmra.mxu0 %vm315_vm0, %v551_v46 }
 0x169   : > { %864 = vmatprep.mubr.f32.mxu0 %v2723_v1 }
 0x16c   : > { %1565 = vmatmul.mubr.msk.f32.gmra.mxu0 %vm315_vm0, %v552_v47 }
 0x16d   : > { %870 = vmatprep.mubr.f32.mxu0 %v2723_v1 }
 0x170   : > { %1566 = vmatmul.mubr.msk.f32.gmra.mxu0 %vm315_vm0, %v553_v48 }
 0x171   : > { %876 = vmatprep.mubr.f32.mxu0 %v2723_v1 }
 0x174   : > { %1567 = vmatmul.mubr.msk.f32.gmra.mxu0 %vm315_vm0, %v554_v49 }
 0x175   : > { %882 = vmatprep.mubr.f32.mxu0 %v2723_v1 }
 0x178   : > { %1568 = vmatmul.mubr.msk.f32.gmra.mxu0 %vm315_vm0, %v555_v50 }
 0x179   : > { %888 = vmatprep.mubr.f32.mxu0 %v2723_v1 }
 0x17c   : > { %1569 = vmatmul.mubr.msk.f32.gmra.mxu0 %vm315_vm0, %v556_v51 }
 0x17d   : > { %894 = vmatprep.mubr.f32.mxu0 %v2723_v1 }
 0x180   : > { %1570 = vmatmul.mubr.msk.f32.gmra.mxu0 %vm315_vm0, %v557_v52 }
 0x181   : > { %900 = vmatprep.mubr.f32.mxu0 %v2723_v1 }
 0x184   : > { %1571 = vmatmul.mubr.msk.f32.gmra.mxu0 %vm315_vm0, %v558_v53 }
 0x185   : > { %906 = vmatprep.mubr.f32.mxu0 %v2723_v1 }
 0x188   : > { %1572 = vmatmul.mubr.msk.f32.gmra.mxu0 %vm315_vm0, %v559_v54 }
 0x1cc   : > { %v2129_v58 = vpop.f32.mrf.mxu0 }
 0x1ce   : > { %v2131_v59 = vpop.f32.mrf.mxu0 }
 0x1d0   : > { %v2133_v60 = vpop.f32.mrf.mxu0 }
 0x1d2   : > { %v2135_v61 = vpop.f32.mrf.mxu0 }
 0x1d3   : > { %2753 = vst [vmem:[#allocation8_spill] sm:$0xff] %v2135_v61 }
 0x1d4   : > { %v2137_v62 = vpop.f32.mrf.mxu0 }
 0x1d5   : > { %v913_v44 = vmax.f32 %v2129_v58, %v2137_v62 }
 0x1d6   : > { %v2139_v63 = vpop.f32.mrf.mxu0 }
 0x1d7   : > { %2754 = vst [vmem:[#allocation9_spill] sm:$0xff] %v2139_v63 }
 0x1d8   : > { %v2141_v0 = vpop.f32.mrf.mxu0 }
 0x1d9   : > { %v914_v45 = vmax.f32 %v2133_v60, %v2141_v0 }
 0x1da   : > { %v2143_v2 = vpop.f32.mrf.mxu0 }
 0x1db   : > { %2755 = vst [vmem:[#allocation10_spill] sm:$0xff] %v2143_v2 }
 0x1dc   : > { %v2145_v3 = vpop.f32.mrf.mxu0 }
 0x1dd   : > { %v915_v47 = vmax.f32 %v913_v44, %v2145_v3 }
 0x1de   : > { %v2147_v4 = vpop.f32.mrf.mxu0 }
 0x1e0   : > { %v2149_v5 = vpop.f32.mrf.mxu0 }
 0x1e1   : > { %v916_v48 = vmax.f32 %v914_v45, %v2149_v5 }
 0x1e2   : > { %v2151_v6 = vpop.f32.mrf.mxu0 }
 0x1e3   : > { %2756 = vst [vmem:[#allocation11_spill] sm:$0xff] %v2151_v6 }
 0x1e4   : > { %v2153_v7 = vpop.f32.mrf.mxu0 }
 0x1e5   : > { %v917_v50 = vmax.f32 %v915_v47, %v2153_v7 }
 0x1e6   : > { %v2155_v8 = vpop.f32.mrf.mxu0 }
 0x1e8   : > { %v2157_v9 = vpop.f32.mrf.mxu0 }
 0x1e9   : > { %v918_v51 = vmax.f32 %v916_v48, %v2157_v9 }
 0x1ea   : > { %v2159_v10 = vpop.f32.mrf.mxu0 }
 0x1eb   : > { %2757 = vst [vmem:[#allocation12_spill] sm:$0xff] %v2159_v10 }
 0x1ec   : > { %v2161_v11 = vpop.f32.mrf.mxu0 }
 0x1ed   : > { %2758 = vst [vmem:[#allocation13_spill] sm:$0xff] %v2161_v11  ;;  %v919_v53 = vmax.f32 %v917_v50, %v2161_v11 }
 0x1ee   : > { %v2163_v12 = vpop.f32.mrf.mxu0 }
 0x1ef   : > { %2759 = vst [vmem:[#allocation14_spill] sm:$0xff] %v2163_v12 }
 0x1f0   : > { %v2165_v13 = vpop.f32.mrf.mxu0 }
 0x1f1   : > { %v920_v54 = vmax.f32 %v918_v51, %v2165_v13 }
 0x1f2   : > { %v2167_v14 = vpop.f32.mrf.mxu0 }
 0x1f3   : > { %2760 = vst [vmem:[#allocation15_spill] sm:$0xff] %v2167_v14 }
 0x1f4   : > { %v2169_v15 = vpop.f32.mrf.mxu0 }
 0x1f5   : > { %2761 = vst [vmem:[#allocation16_spill] sm:$0xff] %v2169_v15  ;;  %v921_v56 = vmax.f32 %v919_v53, %v2169_v15 }
 0x1f6   : > { %v2171_v16 = vpop.f32.mrf.mxu0 }
 0x1f8   : > { %v2173_v17 = vpop.f32.mrf.mxu0 }
 0x1f9   : > { %v922_v57 = vmax.f32 %v920_v54, %v2173_v17 }
 0x1fa   : > { %v2175_v18 = vpop.f32.mrf.mxu0 }
 0x1fc   : > { %v2177_v19 = vpop.f32.mrf.mxu0 }
 0x1fd   : > { %2762 = vst [vmem:[#allocation17_spill] sm:$0xff] %v2177_v19  ;;  %v923_v45 = vmax.f32 %v921_v56, %v2177_v19 }
 0x1fe   : > { %v2179_v20 = vpop.f32.mrf.mxu0 }
 0x200   : > { %v2181_v21 = vpop.f32.mrf.mxu0 }
 0x201   : > { %v924_v47 = vmax.f32 %v922_v57, %v2181_v21  ;;  %v951_v57 = vmax.f32 %v2135_v61, %v2143_v2 }
 0x202   : > { %v2183_v22 = vpop.f32.mrf.mxu0 }
 0x204   : > { %v2185_v23 = vpop.f32.mrf.mxu0 }
 0x205   : > { %v925_v48 = vmax.f32 %v923_v45, %v2185_v23 }
 0x206   : > { %v2187_v24 = vpop.f32.mrf.mxu0 }
 0x208   : > { %v2189_v25 = vpop.f32.mrf.mxu0 }
 0x209   : > { %2763 = vst [vmem:[#allocation18_spill] sm:$0xff] %v2189_v25  ;;  %v926_v50 = vmax.f32 %v924_v47, %v2189_v25 }
 0x20a   : > { %v2191_v26 = vpop.f32.mrf.mxu0 }
 0x20c   : > { %v2193_v27 = vpop.f32.mrf.mxu0 }
 0x20d   : > { %v927_v51 = vmax.f32 %v925_v48, %v2193_v27  ;;  %v950_v48 = vmax.f32 %v2131_v59, %v2139_v63 }
 0x20e   : > { %v2195_v28 = vpop.f32.mrf.mxu0 }
 0x210   : > { %v2197_v29 = vpop.f32.mrf.mxu0 }
 0x211   : > { %v928_v53 = vmax.f32 %v926_v50, %v2197_v29  ;;  %v953_v50 = vmax.f32 %v951_v57, %v2151_v6 }
 0x212   : > { %v2199_v30 = vpop.f32.mrf.mxu0 }
 0x213   : > { %v955_v2 = vmax.f32 %v953_v50, %v2159_v10 }
 0x214   : > { %v2201_v31 = vpop.f32.mrf.mxu0 }
 0x215   : > { %2764 = vst [vmem:[#allocation19_spill] sm:$0xff] %v2201_v31  ;;  %v929_v54 = vmax.f32 %v927_v51, %v2201_v31  ;;  %v952_v31 = vmax.f32 %v950_v48, %v2147_v4  ;;  %v957_v57 = vmax.f32 %v955_v2, %v2167_v14 }
 0x216   : > { %v2203_v32 = vpop.f32.mrf.mxu0 }
 0x217   : > { %v954_v63 = vmax.f32 %v952_v31, %v2155_v8  ;;  %v959_v50 = vmax.f32 %v957_v57, %v2175_v18 }
 0x218   : > { %v2205_v33 = vpop.f32.mrf.mxu0 }
 0x219   : > { %2765 = vst [vmem:[#allocation20_spill] sm:$0xff] %v2205_v33  ;;  %v930_v56 = vmax.f32 %v928_v53, %v2205_v33  ;;  %v956_v48 = vmax.f32 %v954_v63, %v2163_v12  ;;  %v961_v2 = vmax.f32 %v959_v50, %v2183_v22 }
 0x21a   : > { %v2207_v34 = vpop.f32.mrf.mxu0 }
 0x21b   : > { %v958_v31 = vmax.f32 %v956_v48, %v2171_v16  ;;  %v963_v63 = vmax.f32 %v961_v2, %v2191_v26 }
 0x21c   : > { %v2209_v35 = vpop.f32.mrf.mxu0 }
 0x21d   : > { %v931_v45 = vmax.f32 %v929_v54, %v2209_v35  ;;  %v960_v14 = vmax.f32 %v958_v31, %v2179_v20 }
 0x21e   : > { %v2211_v36 = vpop.f32.mrf.mxu0 }
 0x21f   : > { %v962_v57 = vmax.f32 %v960_v14, %v2187_v24 }
 0x220   : > { %v2213_v37 = vpop.f32.mrf.mxu0 }
 0x221   : > { %v932_v47 = vmax.f32 %v930_v56, %v2213_v37  ;;  %v964_v48 = vmax.f32 %v962_v57, %v2195_v28 }
 0x222   : > { %v2215_v38 = vpop.f32.mrf.mxu0 }
 0x224   : > { %v2217_v39 = vpop.f32.mrf.mxu0 }
 0x225   : > { %v933_v51 = vmax.f32 %v931_v45, %v2217_v39 }
 0x226   : > { %v2219_v40 = vpop.f32.mrf.mxu0 }
 0x228   : > { %v2221_v41 = vpop.f32.mrf.mxu0 }
 0x229   : > { %v934_v53 = vmax.f32 %v932_v47, %v2221_v41 }
 0x22a   : > { %v2223_v42 = vpop.f32.mrf.mxu0 }
 0x22c   : > { %v2225_v43 = vpop.f32.mrf.mxu0 }
 0x22d   : > { %v935_v54 = vmax.f32 %v933_v51, %v2225_v43 }
 0x22e   : > { %v2231_v46 = vpop.f32.mrf.mxu0 }
 0x230   : > { %v2235_v49 = vpop.f32.mrf.mxu0 }
 0x231   : > { %v936_v56 = vmax.f32 %v934_v53, %v2235_v49 }
 0x232   : > { %v2239_v52 = vpop.f32.mrf.mxu0 }
 0x234   : > { %v2243_v55 = vpop.f32.mrf.mxu0 }
 0x235   : > { %v937_v45 = vmax.f32 %v935_v54, %v2243_v55 }
 0x236   : > { %v2247_v44 = vpop.f32.mrf.mxu0 }
 0x238   : > { %v2251_v1 = vpop.f32.mrf.mxu0 }
 0x239   : > { %v938_v47 = vmax.f32 %v936_v56, %v2251_v1 }
 0x23a   : > { %v2255_v11 = vpop.f32.mrf.mxu0 }
 0x23c   : > { %v2259_v15 = vpop.f32.mrf.mxu0 }
 0x23d   : > { %2766 = vst [vmem:[#allocation21_spill] sm:$0xff] %v2259_v15  ;;  %v939_v51 = vmax.f32 %v937_v45, %v2259_v15  ;;  %v965_v45 = vmax.f32 %v963_v63, %v2199_v30 }
 0x23e   : > { %v2263_v19 = vpop.f32.mrf.mxu0 }
 0x23f   : > { %v967_v50 = vmax.f32 %v965_v45, %v2207_v34 }
 0x240   : > { %v2269_v25 = vpop.f32.mrf.mxu0 }
 0x241   : > { %2767 = vst [vmem:[#allocation22_spill] sm:$0xff] %v2269_v25  ;;  %v940_v53 = vmax.f32 %v938_v47, %v2269_v25  ;;  %v2304_v25 = vpop.f32.mrf.mxu1 }
 0x242   : > { %v2276_v33 = vpop.f32.mrf.mxu0  ;;  %2769 = vst [vmem:[#allocation24_spill] sm:$0xff] %v2304_v25 }
 0x244   : > { %v2282_v61 = vpop.f32.mrf.mxu0 }
 0x245   : > { %v941_v54 = vmax.f32 %v939_v51, %v2282_v61  ;;  %v966_v51 = vmax.f32 %v964_v48, %v2203_v32 }
 0x246   : > { %v2288_v6 = vpop.f32.mrf.mxu0 }
 0x247   : > { %v968_v2 = vmax.f32 %v966_v51, %v2211_v36 }
 0x248   : > { %v2294_v10 = vpop.f32.mrf.mxu0 }
 0x249   : > { %2768 = vst [vmem:[#allocation23_spill] sm:$0xff] %v2294_v10  ;;  %v942_v56 = vmax.f32 %v940_v53, %v2294_v10  ;;  %v969_v53 = vmax.f32 %v967_v50, %v2215_v38  ;;  %v487_v10 = vpop.f32.mrf.mxu1  ;;  %v970_v57 = vmax.f32 %v968_v2, %v2219_v40 }
 0x24a   : > { %v2319_v50 = vpop.f32.mrf.mxu0 }
 0x24b   : > { %v943_v12 = vmax.f32 %v941_v54, %v942_v56  ;;  %v971_v14 = vmax.f32 %v969_v53, %v2223_v42  ;;  %v2312_v56 = vpop.permute.xlu1 %405 }
 0x24c   : > { %2770 = vst [vmem:[#allocation25_spill] sm:$0xff] %v2312_v56  ;;  %v488_v63 = vadd.f32 %v487_v10, %v2312_v56 }
 0x24d   : > { %v944_v47 = vrot.slane %v943_v12, 4  ;;  %v973_v45 = vmax.f32 %v971_v14, %v2239_v52 }
 0x24e   : > { %1319 = vmatprep.mubr.f32.mxu1 %v488_v63 }
 0x24f   : > { %v945_v15 = vmax.f32 %v943_v12, %v944_v47  ;;  %v972_v47 = vmax.f32 %v970_v57, %v2231_v46  ;;  %v975_v48 = vmax.f32 %v973_v45, %v2255_v11 }
 0x251   : > { %v946_v31 = vrot.slane %v945_v15, 2  ;;  %v974_v51 = vmax.f32 %v972_v47, %v2247_v44 }
 0x253   : > { %v947_v54 = vmax.f32 %v945_v15, %v946_v31  ;;  %v977_v15 = vmax.f32 %v975_v48, %v2276_v33  ;;  %v976_v10 = vmax.f32 %v974_v51, %v2263_v19 }
 0x255   : > { %v948_v12 = vrot.slane %v947_v54, 1  ;;  %v979_v31 = vmax.f32 %v977_v15, %v2319_v50  ;;  %v978_v2 = vmax.f32 %v976_v10, %v2288_v6 }
 0x257   : > { %v2323_v53 = vmax.f32 %v947_v54, %v948_v12  ;;  %v980_v45 = vmax.f32 %v978_v2, %v979_v31 }
 0x259   : > { %v987_v14 = vsub.f32 %v2129_v58, %v2323_v53  ;;  %v989_v63 = vsub.f32 %v2133_v60, %v2323_v53  ;;  %v991_v57 = vsub.f32 %v2137_v62, %v2323_v53  ;;  %v993_v54 = vsub.f32 %v2141_v0, %v2323_v53 }
 0x25a   : > { %v995_v48 = vsub.f32 %v2145_v3, %v2323_v53  ;;  %v981_v15 = vrot.slane %v980_v45, 4  ;;  %v997_v58 = vsub.f32 %v2149_v5, %v2323_v53  ;;  %v999_v62 = vsub.f32 %v2153_v7, %v2323_v53  ;;  %v2771_v3 = vld [vmem:[#allocation13_spill] sm:$0xff]  ;;  %v2772_v7 = vld [vmem:[#allocation16_spill] sm:$0xff] }
 0x25b   : > { %v1051_v12 = vmul.f32 1.442695, %v987_v14  ;;  %v1055_v47 = vmul.f32 1.442695, %v989_v63  ;;  %v1059_v51 = vmul.f32 1.442695, %v991_v57  ;;  %v1001_v0 = vsub.f32 %v2157_v9, %v2323_v53 }
 0x25c   : > { %v1063_v60 = vmul.f32 1.442695, %v993_v54  ;;  %v1067_v10 = vmul.f32 1.442695, %v995_v48  ;;  %v982_v31 = vmax.f32 %v980_v45, %v981_v15  ;;  %v1071_v2 = vmul.f32 1.442695, %v997_v58 }
 0x25d   : > { %1636 = vpow2.f32 %v1051_v12  ;;  %v1003_v14 = vsub.f32 %v2771_v3, %v2323_v53  ;;  %v1075_v63 = vmul.f32 1.442695, %v999_v62  ;;  %v1005_v5 = vsub.f32 %v2165_v13, %v2323_v53  ;;  %v2773_v58 = vld [vmem:[#allocation17_spill] sm:$0xff] }
 0x25e   : > { %1638 = vpow2.f32 %v1055_v47  ;;  %v983_v57 = vrot.slane %v982_v31, 2  ;;  %v1079_v54 = vmul.f32 1.442695, %v1001_v0  ;;  %v1007_v12 = vsub.f32 %v2772_v7, %v2323_v53 }
 0x25f   : > { %1640 = vpow2.f32 %v1059_v51  ;;  %v1083_v45 = vmul.f32 1.442695, %v1003_v14  ;;  %v1009_v48 = vsub.f32 %v2173_v17, %v2323_v53  ;;  %v1087_v51 = vmul.f32 1.442695, %v1005_v5 }
 0x260   : > { %1642 = vpow2.f32 %v1063_v60  ;;  %v984_v47 = vmax.f32 %v982_v31, %v983_v57  ;;  %v1011_v13 = vsub.f32 %v2773_v58, %v2323_v53  ;;  %v1013_v60 = vsub.f32 %v2181_v21, %v2323_v53 }
 0x261   : > { %1644 = vpow2.f32 %v1067_v10  ;;  %v1091_v62 = vmul.f32 1.442695, %v1007_v12  ;;  %v1015_v17 = vsub.f32 %v2185_v23, %v2323_v53  ;;  %v1095_v14 = vmul.f32 1.442695, %v1009_v48 }
 0x262   : > { %1646 = vpow2.f32 %v1071_v2  ;;  %v985_v0 = vrot.slane %v984_v47, 1  ;;  %v2774_v2 = vld [vmem:[#allocation18_spill] sm:$0xff]  ;;  %v1019_v21 = vsub.f32 %v2193_v27, %v2323_v53  ;;  %v1099_v5 = vmul.f32 1.442695, %v1011_v13 }
 0x263   : > { %1648 = vpow2.f32 %v1075_v63  ;;  %v1017_v3 = vsub.f32 %v2774_v2, %v2323_v53  ;;  %v1103_v7 = vmul.f32 1.442695, %v1013_v60  ;;  %v1027_v60 = vsub.f32 %v2209_v35, %v2323_v53 }
 0x264   : > { %1650 = vpow2.f32 %v1079_v54  ;;  %v1021_v54 = vsub.f32 %v2197_v29, %v2323_v53  ;;  %v2380_v58 = vmax.f32 %v984_v47, %v985_v0 }
 0x265   : > { %1652 = vpow2.f32 %v1083_v45  ;;  %v2775_v45 = vld [vmem:[#allocation19_spill] sm:$0xff]  ;;  %v1111_v27 = vmul.f32 1.442695, %v1017_v3 }
 0x266   : > { %1654 = vpow2.f32 %v1087_v51  ;;  %v1023_v48 = vsub.f32 %v2775_v45, %v2323_v53  ;;  %v1107_v51 = vmul.f32 1.442695, %v1015_v17  ;;  %v1119_v47 = vmul.f32 1.442695, %v1021_v54 }
 0x267   : > { %1656 = vpow2.f32 %v1091_v62  ;;  %v1115_v62 = vmul.f32 1.442695, %v1019_v21  ;;  %v2777_v21 = vld [vmem:[#allocation8_spill] sm:$0xff]  ;;  %v1131_v54 = vmul.f32 1.442695, %v1027_v60 }
 0x268   : > { %1658 = vpow2.f32 %v1095_v14  ;;  %v1123_v3 = vmul.f32 1.442695, %v1023_v48  ;;  %v988_v14 = vsub.f32 %v2131_v59, %v2380_v58  ;;  %v2778_v59 = vld [vmem:[#allocation9_spill] sm:$0xff] }
 0x269   : > { %1660 = vpow2.f32 %v1099_v5  ;;  %v990_v5 = vsub.f32 %v2777_v21, %v2380_v58 }
 0x26a   : > { %v2350_v9 = vpop.eup %1636  ;;  %1662 = vpow2.f32 %v1103_v7 }
 0x26b   : > { %v2354_v15 = vpop.eup %1638  ;;  %1664 = vpow2.f32 %v1107_v51  ;;  %v992_v51 = vsub.f32 %v2778_v59, %v2380_v58 }
 0x26c   : > { %v1179_v10 = vadd.f32 %v2354_v15, %v2350_v9  ;;  %v2362_v31 = vpop.eup %1640  ;;  %1666 = vpow2.f32 %v1111_v27  ;;  %v1053_v27 = vmul.f32 1.442695, %v988_v14 }
 0x26d   : > { %v2369_v57 = vpop.eup %1642  ;;  %1668 = vpow2.f32 %v1115_v62  ;;  %v1057_v62 = vmul.f32 1.442695, %v990_v5 }
 0x26e   : > { %v1180_v63 = vadd.f32 %v2362_v31, %v1179_v10  ;;  %v2376_v12 = vpop.eup %1644  ;;  %v2776_v10 = vld [vmem:[#allocation20_spill] sm:$0xff]  ;;  %1670 = vpow2.f32 %v1119_v47  ;;  %v1035_v47 = vsub.f32 %v2225_v43, %v2323_v53  ;;  %v2780_v43 = vld [vmem:[#allocation11_spill] sm:$0xff] }
 0x26f   : > { %v1025_v2 = vsub.f32 %v2776_v10, %v2323_v53  ;;  %v2385_v29 = vpop.eup %1646  ;;  %1672 = vpow2.f32 %v1123_v3  ;;  %v1061_v3 = vmul.f32 1.442695, %v992_v51  ;;  %v1000_v51 = vsub.f32 %v2155_v8, %v2380_v58 }
 0x270   : > { %v1181_v23 = vadd.f32 %v2369_v57, %v1180_v63  ;;  %v1029_v63 = vsub.f32 %v2213_v37, %v2323_v53  ;;  %v2392_v0 = vpop.eup %1648  ;;  %v1031_v37 = vsub.f32 %v2217_v39, %v2323_v53  ;;  %v2779_v39 = vld [vmem:[#allocation10_spill] sm:$0xff] }
 0x271   : > { %v2399_v45 = vpop.eup %1650  ;;  %v994_v60 = vsub.f32 %v2779_v39, %v2380_v58 }
 0x272   : > { %v1182_v13 = vadd.f32 %v2376_v12, %v1181_v23  ;;  %v1127_v23 = vmul.f32 1.442695, %v1025_v2  ;;  %v1135_v7 = vmul.f32 1.442695, %v1029_v63  ;;  %v2406_v10 = vpop.eup %1652  ;;  %v1033_v2 = vsub.f32 %v2221_v41, %v2323_v53 }
 0x273   : > { %v2413_v63 = vpop.eup %1654  ;;  %v996_v41 = vsub.f32 %v2147_v4, %v2380_v58  ;;  %v1039_v4 = vsub.f32 %v2243_v55, %v2323_v53 }
 0x274   : > { %v1183_v17 = vadd.f32 %v2385_v29, %v1182_v13  ;;  %1674 = vpow2.f32 %v1127_v23  ;;  %v2420_v14 = vpop.eup %1656  ;;  %v1037_v23 = vsub.f32 %v2235_v49, %v2323_v53  ;;  %v1143_v21 = vmul.f32 1.442695, %v1033_v2 }
 0x275   : > { %1676 = vpow2.f32 %v1131_v54  ;;  %v998_v54 = vsub.f32 %v2780_v43, %v2380_v58  ;;  %v1069_v2 = vmul.f32 1.442695, %v996_v41  ;;  %v1155_v8 = vmul.f32 1.442695, %v1039_v4  ;;  %v2782_v41 = vld [vmem:[#allocation14_spill] sm:$0xff] }
 0x276   : > { %v1184_v35 = vadd.f32 %v2392_v0, %v1183_v17  ;;  %v1139_v17 = vmul.f32 1.442695, %v1031_v37  ;;  %1678 = vpow2.f32 %v1135_v7  ;;  %v1065_v37 = vmul.f32 1.442695, %v994_v60  ;;  %v2427_v7 = vpop.eup %1658 }
 0x277   : > { %1680 = vpow2.f32 %v1053_v27  ;;  %v2431_v59 = vpop.eup %1660  ;;  %v1151_v39 = vmul.f32 1.442695, %v1037_v23  ;;  %v1018_v23 = vsub.f32 %v2191_v26, %v2380_v58  ;;  %v1008_v26 = vsub.f32 %v2171_v16, %v2380_v58 }
 0x278   : > { %v1185_v48 = vadd.f32 %v2399_v45, %v1184_v35  ;;  %1682 = vpow2.f32 %v1057_v62  ;;  %v2436_v27 = vpop.eup %1662  ;;  %v2781_v62 = vld [vmem:[#allocation12_spill] sm:$0xff] }
 0x279   : > { %1684 = vpow2.f32 %v1139_v17  ;;  %v2440_v60 = vpop.eup %1664  ;;  %v1073_v17 = vmul.f32 1.442695, %v998_v54 }
 0x27a   : > { %v1186_v13 = vadd.f32 %v2406_v10, %v1185_v48  ;;  %v1147_v48 = vmul.f32 1.442695, %v1035_v47  ;;  %1686 = vpow2.f32 %v1061_v3  ;;  %v1002_v47 = vsub.f32 %v2781_v62, %v2380_v58 }
 0x27b   : > { %1688 = vpow2.f32 %v1143_v21  ;;  %v1004_v3 = vsub.f32 %v2782_v41, %v2380_v58  ;;  %v1077_v21 = vmul.f32 1.442695, %v1000_v51  ;;  %v1016_v62 = vsub.f32 %v2187_v24, %v2380_v58 }
 0x27c   : > { %v1187_v35 = vadd.f32 %v2413_v63, %v1186_v13  ;;  %v1041_v13 = vsub.f32 %v2251_v1, %v2323_v53  ;;  %1690 = vpow2.f32 %v1065_v37  ;;  %v2785_v37 = vld [vmem:[#allocation15_spill] sm:$0xff]  ;;  %v1010_v24 = vsub.f32 %v2175_v18, %v2380_v58 }
 0x27d   : > { %1692 = vpow2.f32 %v1147_v48  ;;  %v1006_v48 = vsub.f32 %v2785_v37, %v2380_v58  ;;  %v1085_v51 = vmul.f32 1.442695, %v1004_v3  ;;  %v1109_v3 = vmul.f32 1.442695, %v1016_v62 }
 0x27e   : > { %v1188_v5 = vadd.f32 %v2420_v14, %v1187_v35  ;;  %v2445_v35 = vpop.eup %1666  ;;  %1694 = vpow2.f32 %v1069_v2  ;;  %v1159_v54 = vmul.f32 1.442695, %v1041_v13 }
 0x27f   : > { %1696 = vpow2.f32 %v1151_v39  ;;  %v1014_v39 = vsub.f32 %v2183_v22, %v2380_v58  ;;  %v2789_v22 = vld [vmem:[#allocation21_spill] sm:$0xff] }
 0x280   : > { %v1189_v49 = vadd.f32 %v2427_v7, %v1188_v5  ;;  %v2449_v5 = vpop.eup %1668  ;;  %1698 = vpow2.f32 %v1073_v17 }
 0x281   : > { %2783 = vst [vmem:[#allocation13_spill] sm:$0xff] %v2449_v5  ;;  %v2454_v43 = vpop.eup %1670  ;;  %1700 = vpow2.f32 %v1155_v8  ;;  %v1012_v8 = vsub.f32 %v2179_v20, %v2380_v58  ;;  %v2790_v20 = vld [vmem:[#allocation22_spill] sm:$0xff] }
 0x282   : > { %v1190_v55 = vadd.f32 %v2431_v59, %v1189_v49  ;;  %2784 = vst [vmem:[#allocation16_spill] sm:$0xff] %v2454_v43  ;;  %v2458_v4 = vpop.eup %1672  ;;  %1702 = vpow2.f32 %v1077_v21  ;;  %v1093_v21 = vmul.f32 1.442695, %v1008_v26  ;;  %v1045_v62 = vsub.f32 %v2790_v20, %v2323_v53 }
 0x283   : > { %2786 = vst [vmem:[#allocation17_spill] sm:$0xff] %v2458_v4  ;;  %v2463_v41 = vpop.eup %1674  ;;  %1704 = vpow2.f32 %v1159_v54 }
 0x284   : > { %v1191_v1 = vadd.f32 %v2436_v27, %v1190_v55  ;;  %v1081_v55 = vmul.f32 1.442695, %v1002_v47  ;;  %2787 = vst [vmem:[#allocation18_spill] sm:$0xff] %v2463_v41  ;;  %v2467_v2 = vpop.eup %1676  ;;  %v1089_v47 = vmul.f32 1.442695, %v1006_v48 }
 0x285   : > { %2788 = vst [vmem:[#allocation19_spill] sm:$0xff] %v2467_v2  ;;  %v2472_v37 = vpop.eup %1678  ;;  %v1105_v48 = vmul.f32 1.442695, %v1014_v39 }
 0x286   : > { %v1192_v49 = vadd.f32 %v2440_v60, %v1191_v1  ;;  %v1113_v1 = vmul.f32 1.442695, %v1018_v23  ;;  %v2476_v17 = vpop.eup %1680  ;;  %1706 = vpow2.f32 %v1081_v55  ;;  %v1043_v23 = vsub.f32 %v2789_v22, %v2323_v53 }
 0x287   : > { %1708 = vpow2.f32 %v1085_v51  ;;  %v1097_v55 = vmul.f32 1.442695, %v1010_v24  ;;  %v1101_v51 = vmul.f32 1.442695, %v1012_v8  ;;  %v2791_v8 = vld [vmem:[#allocation23_spill] sm:$0xff] }
 0x288   : > { %v1193_v13 = vadd.f32 %v2445_v35, %v1192_v49  ;;  %v2481_v49 = vpop.eup %1682  ;;  %1710 = vpow2.f32 %v1113_v1  ;;  %v1047_v1 = vsub.f32 %v2282_v61, %v2323_v53  ;;  %v1163_v56 = vmul.f32 1.442695, %v1043_v23 }
 0x289   : > { %v2485_v54 = vpop.eup %1684  ;;  %1712 = vpow2.f32 %v1089_v47 }
 0x28a   : > { %v1194_v16 = vadd.f32 %v2449_v5, %v1193_v13  ;;  %v1216_v13 = vadd.f32 %v2481_v49, %v2476_v17  ;;  %v2490_v5 = vpop.eup %1686  ;;  %1714 = vpow2.f32 %v1109_v3  ;;  %v1049_v3 = vsub.f32 %v2791_v8, %v2323_v53 }
 0x28b   : > { %v2494_v25 = vpop.eup %1688  ;;  %1716 = vpow2.f32 %v1093_v21  ;;  %v1020_v53 = vsub.f32 %v2195_v28, %v2380_v58  ;;  %v1024_v28 = vsub.f32 %v2203_v32, %v2380_v58 }
 0x28c   : > { %v1195_v18 = vadd.f32 %v2454_v43, %v1194_v16  ;;  %v1217_v16 = vadd.f32 %v2490_v5, %v1216_v13  ;;  %v2498_v39 = vpop.eup %1690  ;;  %1718 = vpow2.f32 %v1105_v48  ;;  %v1167_v13 = vmul.f32 1.442695, %v1045_v62 }
 0x28d   : > { %v2502_v22 = vpop.eup %1692  ;;  %1720 = vpow2.f32 %v1097_v55  ;;  %v1175_v62 = vmul.f32 1.442695, %v1049_v3 }
 0x28e   : > { %v1196_v26 = vadd.f32 %v2458_v4, %v1195_v18  ;;  %v1218_v24 = vadd.f32 %v2498_v39, %v1217_v16  ;;  %v2506_v20 = vpop.eup %1694  ;;  %1722 = vpow2.f32 %v1101_v51 }
 0x28f   : > { %v2510_v18 = vpop.eup %1696  ;;  %1724 = vpow2.f32 %v1163_v56 }
 0x290   : > { %v1197_v47 = vadd.f32 %v2463_v41, %v1196_v26  ;;  %v1219_v21 = vadd.f32 %v2506_v20, %v1218_v24  ;;  %v2514_v23 = vpop.eup %1698  ;;  %v1171_v26 = vmul.f32 1.442695, %v1047_v1  ;;  %1726 = vpow2.f32 %v1167_v13 }
 0x291   : > { %v2516_v48 = vpop.eup %1700  ;;  %v1022_v1 = vsub.f32 %v2199_v30, %v2380_v58  ;;  %v1026_v30 = vsub.f32 %v2207_v34, %v2380_v58  ;;  %v1125_v34 = vmul.f32 1.442695, %v1024_v28 }
 0x292   : > { %v1198_v61 = vadd.f32 %v2467_v2, %v1197_v47  ;;  %v1220_v55 = vadd.f32 %v2514_v23, %v1219_v21  ;;  %v2522_v8 = vpop.eup %1702  ;;  %1728 = vpow2.f32 %v1171_v26  ;;  %v1117_v21 = vmul.f32 1.442695, %v1020_v53 }
 0x293   : > { %v2524_v47 = vpop.eup %1704  ;;  %1730 = vpow2.f32 %v1175_v62  ;;  %v1121_v4 = vmul.f32 1.442695, %v1022_v1  ;;  %v1028_v53 = vsub.f32 %v2211_v36, %v2380_v58  ;;  %v1030_v1 = vsub.f32 %v2215_v38, %v2380_v58 }
 0x294   : > { %v1199_v16 = vadd.f32 %v2472_v37, %v1198_v61  ;;  %v1221_v56 = vadd.f32 %v2522_v8, %v1220_v55  ;;  %v2530_v24 = vpop.eup %1706  ;;  %1732 = vpow2.f32 %v1117_v21  ;;  %v1129_v36 = vmul.f32 1.442695, %v1026_v30 }
 0x295   : > { %v2534_v61 = vpop.eup %1708  ;;  %1734 = vpow2.f32 %v1121_v4  ;;  %v1032_v21 = vsub.f32 %v2219_v40, %v2380_v58  ;;  %v1034_v4 = vsub.f32 %v2223_v42, %v2380_v58  ;;  %v1137_v30 = vmul.f32 1.442695, %v1030_v1 }
 0x296   : > { %v1200_v51 = vadd.f32 %v2485_v54, %v1199_v16  ;;  %v1222_v13 = vadd.f32 %v2530_v24, %v1221_v56  ;;  %v2538_v43 = vpop.eup %1710  ;;  %1736 = vpow2.f32 %v1125_v34  ;;  %v1038_v34 = vsub.f32 %v2239_v52, %v2380_v58 }
 0x297   : > { %v1713_v16 = vpop.eup %1712  ;;  %1255 = vmatprep.subr.mxu1 %v2538_v43  ;;  %1738 = vpow2.f32 %v1129_v36  ;;  %v1048_v1 = vsub.f32 %v2288_v6, %v2380_v58 }
 0x298   : > { %v1201_v3 = vadd.f32 %v2494_v25, %v1200_v51  ;;  %v1223_v32 = vadd.f32 %v2534_v61, %v1222_v13  ;;  %v1715_v26 = vpop.eup %1714  ;;  %1256 = vmatpush1.msra.mxu1 %v2445_v35 }
 0x299   : > { %v1717_v51 = vpop.eup %1716  ;;  %1257 = vmatprep.subr.mxu1 %v1715_v26 }
 0x29a   : > { %v1202_v55 = vadd.f32 %v2502_v22, %v1201_v3  ;;  %v1224_v41 = vadd.f32 %v1713_v16, %v1223_v32  ;;  %v1719_v62 = vpop.eup %1718  ;;  %1258 = vmatpush1.msra.mxu1 %v2440_v60  ;;  %v1036_v32 = vsub.f32 %v2231_v46, %v2380_v58 }
 0x29b   : > { %v1721_v3 = vpop.eup %1720  ;;  %1259 = vmatprep.subr.mxu1 %v1719_v62 }
 0x29c   : > { %v1203_v56 = vadd.f32 %v2510_v18, %v1202_v55  ;;  %v1225_v2 = vadd.f32 %v1717_v51, %v1224_v41  ;;  %v1723_v35 = vpop.eup %1722  ;;  %1260 = vmatpush1.msra.mxu1 %v2436_v27  ;;  %v1133_v55 = vmul.f32 1.442695, %v1028_v53  ;;  %v1149_v52 = vmul.f32 1.442695, %v1036_v32 }
 0x29d   : > { %1261 = vmatprep.subr.mxu1 %v1723_v35  ;;  %v2557_v60 = vpop.eup %1724 }
 0x29e   : > { %v1204_v13 = vadd.f32 %v2516_v48, %v1203_v56  ;;  %v1226_v38 = vadd.f32 %v1721_v3, %v1225_v2  ;;  %1262 = vmatpush1.msra.mxu1 %v2431_v59  ;;  %v2563_v27 = vpop.eup %1726  ;;  %v1050_v2 = vsub.f32 %v2319_v50, %v2380_v58  ;;  %1740 = vpow2.f32 %v1133_v55 }
 0x29f   : > { %1263 = vmatprep.subr.mxu1 %v1721_v3  ;;  %v1141_v59 = vmul.f32 1.442695, %v1032_v21  ;;  %v2571_v56 = vpop.eup %1728  ;;  %1742 = vpow2.f32 %v1137_v30  ;;  %v1145_v50 = vmul.f32 1.442695, %v1034_v4 }
 0x2a0   : > { %v1205_v28 = vadd.f32 %v2524_v47, %v1204_v13  ;;  %v1227_v40 = vadd.f32 %v1723_v35, %v1226_v38  ;;  %1264 = vmatpush1.msra.mxu1 %v2427_v7  ;;  %v2579_v3 = vpop.eup %1730 }
 0x2a1   : > { %1265 = vmatprep.subr.mxu1 %v1717_v51  ;;  %v1040_v51 = vsub.f32 %v2247_v44, %v2380_v58  ;;  %1744 = vpow2.f32 %v1141_v59  ;;  %v1042_v44 = vsub.f32 %v2255_v11, %v2380_v58 }
 0x2a2   : > { %v1206_v41 = vadd.f32 %v2557_v60, %v1205_v28  ;;  %v1228_v53 = vadd.f32 %v1719_v62, %v1227_v40  ;;  %1266 = vmatpush1.msra.mxu1 %v2420_v14  ;;  %v1046_v62 = vsub.f32 %v2276_v33, %v2380_v58  ;;  %v1177_v14 = vmul.f32 1.442695, %v1050_v2 }
 0x2a3   : > { %1267 = vmatprep.subr.mxu1 %v1713_v16  ;;  %v2591_v16 = vpop.eup %1732  ;;  %v1044_v33 = vsub.f32 %v2263_v19, %v2380_v58  ;;  %1746 = vpow2.f32 %v1145_v50  ;;  %v1161_v19 = vmul.f32 1.442695, %v1042_v44 }
 0x2a4   : > { %v1207_v42 = vadd.f32 %v2563_v27, %v1206_v41  ;;  %v1229_v7 = vadd.f32 %v1715_v26, %v1228_v53  ;;  %1268 = vmatpush1.msra.mxu1 %v2413_v63  ;;  %v1153_v26 = vmul.f32 1.442695, %v1038_v34  ;;  %v1173_v63 = vmul.f32 1.442695, %v1048_v1 }
 0x2a5   : > { %1269 = vmatprep.subr.mxu1 %v2534_v61  ;;  %1748 = vpow2.f32 %v1149_v52  ;;  %v1157_v61 = vmul.f32 1.442695, %v1040_v51  ;;  %v1169_v35 = vmul.f32 1.442695, %v1046_v62  ;;  %v1165_v58 = vmul.f32 1.442695, %v1044_v33 }
 0x2a6   : > { %v1208_v46 = vadd.f32 %v2571_v56, %v1207_v42  ;;  %v1230_v13 = vadd.f32 %v2538_v43, %v1229_v7  ;;  %1270 = vmatpush1.msra.mxu1 %v2406_v10  ;;  %v2600_v43 = vpop.eup %1734  ;;  %1750 = vpow2.f32 %v1177_v14  ;;  %v2799_v1 = vmov 0.0  }
 0x2a7   : > { %1271 = vmatprep.subr.mxu1 %v2530_v24  ;;  %v2605_v10 = vpop.eup %1736  ;;  %1752 = vpow2.f32 %v1153_v26 }
 0x2a8   : > { %v2587_v6 = vadd.f32 %v2579_v3, %v1208_v46  ;;  %v1231_v36 = vadd.f32 %v2591_v16, %v1230_v13  ;;  %1272 = vmatpush1.msra.mxu1 %v2399_v45  ;;  %1754 = vpow2.f32 %v1173_v63  ;;  %v2610_v21 = vpop.eup %1738 }
 0x2a9   : > { %1273 = vmatprep.subr.mxu1 %v2522_v8  ;;  %1756 = vpow2.f32 %v1157_v61 }
 0x2aa   : > { %v1232_v11 = vadd.f32 %v2600_v43, %v1231_v36  ;;  %1274 = vmatpush1.msra.mxu1 %v2392_v0  ;;  %1758 = vpow2.f32 %v1169_v35  ;;  %v1210_v50 = vrot.slane %v2587_v6, 4 }
 0x2ab   : > { %1275 = vmatprep.subr.mxu1 %v2514_v23  ;;  %v1741_v8 = vpop.eup %1740  ;;  %1760 = vpow2.f32 %v1161_v19 }
 0x2ac   : > { %v1233_v24 = vadd.f32 %v2605_v10, %v1232_v11  ;;  %1276 = vmatpush1.msra.mxu1 %v2385_v29  ;;  %1762 = vpow2.f32 %v1165_v58  ;;  %v1743_v28 = vpop.eup %1742  ;;  %v1336_v58 = vld [vmem:[%s2718_s5] sm:$0xff] }
 0x2ad   : > { %1277 = vmatprep.subr.mxu1 %v2506_v20 }
 0x2ae   : > { %v1234_v45 = vadd.f32 %v2610_v21, %v1233_v24  ;;  %1278 = vmatpush1.msra.mxu1 %v2376_v12  ;;  %v1745_v29 = vpop.eup %1744  ;;  %v1337_v24 = vld [vmem:[%s2718_s5 + $0x8] sm:$0xff] }
 0x2af   : > { %1279 = vmatprep.subr.mxu1 %v2498_v39 }
 0x2b0   : > { %v1235_v0 = vadd.f32 %v1741_v8, %v1234_v45  ;;  %1280 = vmatpush1.msra.mxu1 %v2369_v57  ;;  %v1747_v20 = vpop.eup %1746 }
 0x2b1   : > { %1281 = vmatprep.subr.mxu1 %v2490_v5 }
 0x2b2   : > { %v1236_v23 = vadd.f32 %v1743_v28, %v1235_v0  ;;  %1282 = vmatpush1.msra.mxu1 %v2362_v31  ;;  %v1749_v12 = vpop.eup %1748 }
 0x2b3   : > { %1283 = vmatprep.subr.mxu1 %v2481_v49  ;;  %v1751_v39 = vpop.eup %1750 }
 0x2b4   : > { %v1237_v55 = vadd.f32 %v1745_v29, %v1236_v23  ;;  %1284 = vmatpush1.msra.mxu1 %v2354_v15  ;;  %v1753_v57 = vpop.eup %1752 }
 0x2b5   : > { %1285 = vmatprep.subr.mxu1 %v2476_v17  ;;  %v1755_v5 = vpop.eup %1754 }
 0x2b6   : > { %v1238_v38 = vadd.f32 %v1747_v20, %v1237_v55  ;;  %1286 = vmatpush1.msra.mxu1 %v2350_v9  ;;  %v1757_v31 = vpop.eup %1756 }
 0x2b7   : > { %1287 = vmatprep.subr.mxu1 %v1751_v39  ;;  %v1759_v49 = vpop.eup %1758 }
 0x2b8   : > { %v1239_v4 = vadd.f32 %v1749_v12, %v1238_v38  ;;  %1288 = vmatpush2.msra.mxu1 %v2579_v3  ;;  %v1761_v15 = vpop.eup %1760  ;;  %v1211_v3 = vadd.f32 %v1210_v50, %v2587_v6 }
 0x2b9   : > { %1289 = vmatprep.subr.mxu1 %v1755_v5  ;;  %v1763_v40 = vpop.eup %1762 }
 0x2ba   : > { %v1240_v41 = vadd.f32 %v1753_v57, %v1239_v4  ;;  %1290 = vmatpush2.msra.mxu1 %v2571_v56  ;;  %v2798_v56 = vld [vmem:[#allocation13_spill] sm:$0xff]  ;;  %v1212_v62 = vrot.slane %v1211_v3, 2  ;;  %v1770_v4 = vld [vmem:[%s2017_s15 + $0x10] sm:$0xff] }
 0x2bb   : > { %1291 = vmatprep.subr.mxu1 %v1759_v49 }
 0x2bc   : > { %v1241_v30 = vadd.f32 %v1757_v31, %v1240_v41  ;;  %1292 = vmatpush2.msra.mxu1 %v2563_v27  ;;  %v2796_v27 = vld [vmem:[#allocation25_spill] sm:$0xff]  ;;  %v1213_v14 = vadd.f32 %v1212_v62, %v1211_v3  ;;  %v1771_v41 = vld [vmem:[%s2017_s15 + $0x18] sm:$0xff] }
 0x2bd   : > { %1293 = vmatprep.subr.mxu1 %v1763_v40 }
 0x2be   : > { %v1242_v17 = vadd.f32 %v1761_v15, %v1241_v30  ;;  %1294 = vmatpush2.msra.mxu1 %v2557_v60  ;;  %v411_v60 = vpop.permute.xlu0 %410 }
 0x2bf   : > { %1295 = vmatprep.subr.mxu1 %v1761_v15 }
 0x2c0   : > { %v1243_v9 = vadd.f32 %v1763_v40, %v1242_v17  ;;  %1296 = vmatpush2.msra.mxu1 %v2524_v47  ;;  %v2792_v47 = vld [vmem:[#allocation19_spill] sm:$0xff] }
 0x2c1   : > { %1297 = vmatprep.subr.mxu1 %v1757_v31 }
 0x2c2   : > { %v1244_v32 = vadd.f32 %v1759_v49, %v1243_v9  ;;  %1298 = vmatpush2.msra.mxu1 %v2516_v48  ;;  %v491_v48 = vpop.f32.mrf.mxu1 }
 0x2c3   : > { %1299 = vmatprep.subr.mxu1 %v1753_v57  ;;  %v492_v34 = vadd.f32 %v491_v48, %v411_v60 }
 0x2c4   : > { %v1245_v2 = vadd.f32 %v1755_v5, %v1244_v32  ;;  %1300 = vmatpush2.msra.mxu1 %v2510_v18  ;;  %v2793_v18 = vld [vmem:[#allocation18_spill] sm:$0xff] }
 0x2c5   : > { %1301 = vmatprep.subr.mxu1 %v1749_v12  ;;  %v1769_v12 = vld [vmem:[%s2017_s15 + $0x8] sm:$0xff] }
 0x2c6   : > { %v1246_v42 = vadd.f32 %v1751_v39, %v1245_v2  ;;  %1302 = vmatpush2.msra.mxu1 %v2502_v22  ;;  %v2794_v22 = vld [vmem:[#allocation17_spill] sm:$0xff] }
 0x2c7   : > { %1303 = vmatprep.subr.mxu1 %v1747_v20 }
 0x2c8   : > { %1304 = vmatpush2.msra.mxu1 %v2494_v25  ;;  %v493_v25 = vpop.f32.mrf.mxu1  ;;  %v1247_v46 = vrot.slane %v1246_v42, 4 }
 0x2c9   : > { %1305 = vmatprep.subr.mxu1 %v1745_v29  ;;  %v494_v53 = vadd.f32 %v493_v25, %v411_v60 }
 0x2ca   : > { %1306 = vmatpush2.msra.mxu1 %v2485_v54  ;;  %v2795_v54 = vld [vmem:[#allocation16_spill] sm:$0xff]  ;;  %v1248_v7 = vadd.f32 %v1247_v46, %v1246_v42 }
 0x2cb   : > { %1307 = vmatprep.subr.mxu1 %v1743_v28  ;;  %v1768_v28 = vld [vmem:[%s2017_s15] sm:$0xff] }
 0x2cc   : > { %1308 = vmatpush2.msra.mxu1 %v2472_v37  ;;  %v2797_v37 = vld [vmem:[#allocation24_spill] sm:$0xff]  ;;  %v1249_v51 = vrot.slane %v1248_v7, 2 }
 0x2cd   : > { %1309 = vmatprep.subr.mxu1 %v1741_v8  ;;  %v486_v59 = vadd.f32 %v2797_v37, %v2796_v27 }
 0x2ce   : > { %1310 = vmatpush2.msra.mxu1 %v2792_v47  ;;  %v1250_v52 = vadd.f32 %v1249_v51, %v1248_v7 }
 0x2cf   : > { %1311 = vmatprep.subr.mxu1 %v2610_v21  ;;  %v1343_v21 = vpop.permute.xlu1 %1342 }
 0x2d0   : > { %1312 = vmatpush2.msra.mxu1 %v2793_v18  ;;  %v1251_v13 = vrot.slane %v1250_v52, 1 }
 0x2d1   : > { %1313 = vmatprep.subr.mxu1 %v2605_v10 }
 0x2d2   : > { %1314 = vmatpush2.msra.mxu1 %v2794_v22  ;;  %v1252_v44 = vadd.f32 %v1251_v13, %v1250_v52 }
 0x2d3   : > { %1315 = vmatprep.subr.mxu1 %v2600_v43  ;;  %v1348_v55 = vpop.permute.xlu1 %1347 }
 0x2d4   : > { %1316 = vmatpush2.msra.mxu1 %v2795_v54  ;;  %1764 = vrcp.f32 %v1252_v44 }
 0x2d5   : > { %1317 = vmatprep.subr.mxu1 %v2591_v16  ;;  %v1214_v16 = vrot.slane %v1213_v14, 1 }
 0x2d6   : > { %1318 = vmatpush2.msra.mxu1 %v2798_v56 }
 0x2d7   : > { %1320 = vmatmul.mubr.f32.vlgmr.msra.gmra.mxu1 %v486_v59  ;;  %v1215_v26 = vadd.f32 %v1214_v16, %v1213_v14 }
 0x2d8   : > { %1325 = vmatprep.mubr.f32.mxu1 %v494_v53 }
 0x2d9   : > { %1766 = vrcp.f32 %v1215_v26 }
 0x2db   : > { %1326 = vmatmul.mubr.f32.gmra.mxu1 %v492_v34 }
 0x2dc   : > { %1420 = vmatprep.mubr.f32.mxu1 %v2799_v1 }
 0x2e1   : > { %v1765_v43 = vpop.eup %1764 }
 0x2e6   : > { %v1767_v35 = vpop.eup %1766 }
 0x397   : > { %v1321_v33 = vpop.f32.mrf.mxu1 }
 0x398   : > { %v1332_v19 = vmul.f32 %v1767_v35, %v1321_v33 }
 0x399   : > { %v1323_v63 = vpop.f32.mrf.mxu1 }
 0x39a   : > { %v1333_v6 = vmul.f32 %v1765_v43, %v1323_v63 }
 0x39b   : > { %v1327_v36 = vpop.f32.mrf.mxu1 }
 0x39c   : > { %v1334_v10 = vmul.f32 %v1767_v35, %v1327_v36 }
 0x39d   : > { %v1329_v61 = vpop.f32.mrf.mxu1 }
 0x39e   : > { %v1335_v11 = vmul.f32 %v1765_v43, %v1329_v61 }
 0x3a0   : > { %1384 = vmatprep.subr.mxu1 %v1335_v11 }
 0x3a1   : > { %1385 = vmatpush1.msra.mxu1 %v1334_v10 }
 0x3a2   : > { %1386 = vmatprep.subr.mxu1 %v1333_v6 }
 0x3a3   : > { %1387 = vmatpush1.msra.mxu1 %v1332_v19 }
 0x3a4   : > { %1573 = vmatmul.mubr.msk.f32.vlgmr.msra.gmra.mxu1 %vm315_vm0, %v1336_v58 }
 0x3a5   : > { %1426 = vmatprep.mubr.f32.mxu1 %v2799_v1 }
 0x3a8   : > { %1574 = vmatmul.mubr.msk.f32.gmra.mxu1 %vm315_vm0, %v1337_v24 }
 0x464   : > { %v1422_v45 = vpop.f32.mrf.mxu1 }
 0x465   : > { %v1423_v8 = vadd.f32 %v1422_v45, %v1343_v21 }
 0x466   : > { %v1424_v0 = vpop.f32.mrf.mxu1 }
 0x467   : > { %v1433_v23 = vadd.f32 %v1768_v28, %v1423_v8  ;;  %v1425_v29 = vadd.f32 %v1424_v0, %v1343_v21 }
 0x468   : > { %v1428_v20 = vpop.f32.mrf.mxu1 }
 0x469   : > { %1437 = vst [vmem:[%s296_s12] sm:$0xff] %v1433_v23  ;;  %v1434_v38 = vadd.f32 %v1769_v12, %v1425_v29  ;;  %v1429_v39 = vadd.f32 %v1428_v20, %v1348_v55 }
 0x46a   : > { %v1430_v57 = vpop.f32.mrf.mxu1 }
 0x46b   : > { %1438 = vst [vmem:[%s296_s12 + $0x8] sm:$0xff] %v1434_v38  ;;  %v1435_v5 = vadd.f32 %v1770_v4, %v1429_v39  ;;  %v1431_v31 = vadd.f32 %v1430_v57, %v1348_v55 }
 0x46d   : > { %1439 = vst [vmem:[%s296_s12 + $0x10] sm:$0xff] %v1435_v5  ;;  %v1436_v49 = vadd.f32 %v1771_v41, %v1431_v31 }
 0x46f   : > { %1440 = vst [vmem:[%s296_s12 + $0x18] sm:$0xff] %v1436_v49 }
 0x470   : > { %1813 = shalt.err (!%p1810_p10)
}
 0x471   : > { %s1814_s15 = scalar_lea.hbm %s2669_s21, 512  ;;  %s1818_s12 = scalar_lea.hbm %s2720_s7, 1024 }
 0x472   : > { %p1815_p0 = scmp.ne.s32.totalorder %s2669_s21, %s1814_s15  ;;  %p1819_p1 = scmp.lt.s32.totalorder %s2669_s21, %s2720_s7 }
 0x473   : > { %p1820_p3 = scmp.lt.s32.totalorder %s1818_s12, %s1814_s15 }
 0x474   : > { %p1816_p2 = pnand %p1815_p0, %p2800_p12 }
 0x475   : > { %p1821_p6 = por %p1820_p3, %p1819_p1 }
 0x476   : > { %p1817_p9 = pneg %p1816_p2 }
 0x478   : > { %p1822_p11 = pnand %p1821_p6, %p1817_p9 }
 0x47a   : > { %1825 = shalt.err (!%p1822_p11)
}
 0x47b   : > { %s1872_s19 = smov 256   ;;  %s1873_s9 = smov 16  }
 0x47c   : > { %1584 = dma.vmem_to_hbm [thread:$0]  (%p2800_p12), %s2663_s23, 512, %s2669_s21, %s1442_s28, %s1872_s19, %s1872_s19, %s1873_s9  }
 0x47d PF: > { %s1470_s8 = sand.u32 1, %s1852_s24   ;;  %p2801_p13 = scmp.ne.s32.totalorder %s2750_s14, 0 }
 0x47e   : > { %p2802_p4 = scmp.ge.s32.totalorder %s1864_s27, 2  ;;  %s1471_s16 = scalar_lea.sflag [#allocation4], %s1470_s8 }
 0x480   : > { %p1591_p5 = pnand %p2802_p4, %p2801_p13 }
 0x482   : > { %p1592_p7 = pneg %p1591_p5 }
 0x484   : > { %1847 = dma.done.wait (%p1592_p7), %s1471_s16, 512  }
 0x485   : > { %1849 = vsyncadd (%p1592_p7), %s1471_s16, 4294966784  ;;  %p20_p8 = scmp.ge.s32.totalorder %s1939_s30, 4   ;;  %s2803_s24 = smov %s1856_s25 }
 0x486   : > { %s2804_s25 = smov %s1860_s26  ;;  %s2805_s26 = smov %s1951_s10 }
 0x487   : > { %s2806_s27 = smov %s1939_s30  ;;  %22 = sbr.rel (!%p20_p8) target bundleno = 5 (0x5), region = 93 }
 0x48c   :  { %1476 = vsyncpa [#allocation3], 1 }
 0x48d   :  { %1478 = vsyncpa [#allocation3 + $0x1], 1 }
 0x48e   :  { %1479 = vsyncpa [#allocation4], 1 }
 0x48f   :  { %1481 = vsyncpa [#allocation4 + $0x1], 1 }

</bundles_post_ra>
